<compile_context>
chip_gen: v5e
topology: v5e:2x2
jax: 0.10.0
libtpu: 0.0.40
codegen_flags: <defaults>
</compile_context>

<pallas_src>
import jax
import jax.numpy as jnp
from jax.experimental import pallas as pl
from jax.experimental.pallas import tpu as pltpu


def dyt_kernel(alpha_ref, gamma_ref, beta_ref, x_ref, o_ref):
    # alpha_ref: SMEM (1,) f32 ; gamma/beta: VMEM (1, tn) ; x/o: VMEM (tm, tn)
    alpha = alpha_ref[0]                                   # hoisted scalar load
    g = gamma_ref[...].astype(jnp.float32)                 # hoisted resident slice
    b = beta_ref[...].astype(jnp.float32)
    x = x_ref[...].astype(jnp.float32)                     # f32 compute (bf16-safe)
    t = jnp.tanh(x * alpha)                                # EUP transcendental
    o_ref[...] = (g * t + b).astype(o_ref.dtype)


def _choose_tn(D):
    """Largest lane tile (multiple of 128, <= 2048) dividing D, else full D."""
    if D % 128 != 0:
        return D
    for cand in (2048, 1024, 512, 256, 128):
        if cand <= D and D % cand == 0:
            return cand
    return D


def dynamic_tanh(x, alpha, gamma, beta):
    """Pallas DyT. x: (..., D); alpha: scalar or (1,); gamma, beta: (D,)."""
    orig_shape = x.shape
    D = x.shape[-1]
    x2 = x.reshape(-1, D)
    M = x2.shape[0]

    itemsize = jnp.dtype(x.dtype).itemsize
    # Sublane packing: 8 rows (f32) / 16 (bf16) / 32 (int8) per packed vreg tile.
    pack = 8 * max(1, 4 // itemsize)

    tn = _choose_tn(D)

    # Target ~4 MiB per x tile -> double-buffered in+out footprint ~16 MiB.
    target_tile_bytes = 4 * 1024 * 1024
    tm = max(pack, (target_tile_bytes // max(1, tn * itemsize)) // pack * pack)
    # Don't make the row tile bigger than the (sublane-rounded) row count.
    m_rounded = pl.cdiv(M, pack) * pack
    tm = min(tm, m_rounded)

    # Pad rows so the grid covers M exactly (cheap vs shrinking the tile).
    Mp = pl.cdiv(M, tm) * tm
    if Mp != M:
        x2 = jnp.pad(x2, ((0, Mp - M), (0, 0)))

    tile_bytes = tm * tn * itemsize
    # Raise v5e's 16 MiB scoped default; never exceed v7x's 64 MiB physical VMEM.
    vmem_limit = int(min(max(32 * 1024 * 1024, 5 * tile_bytes), 64 * 1024 * 1024))

    alpha_arr = jnp.asarray(alpha, dtype=jnp.float32).reshape(1)
    gamma2 = jnp.asarray(gamma).reshape(1, D)
    beta2 = jnp.asarray(beta).reshape(1, D)

    grid = (Mp // tm, D // tn)

    out = pl.pallas_call(
        dyt_kernel,
        out_shape=jax.ShapeDtypeStruct((Mp, D), x.dtype),
        grid=grid,
        in_specs=[
            pl.BlockSpec(memory_space=pltpu.MemorySpace.SMEM),      # alpha scalar
            pl.BlockSpec((1, tn), lambda i, j: (0, j)),             # gamma slice
            pl.BlockSpec((1, tn), lambda i, j: (0, j)),             # beta slice
            pl.BlockSpec((tm, tn), lambda i, j: (i, j)),            # x tile
        ],
        out_specs=pl.BlockSpec((tm, tn), lambda i, j: (i, j)),
        compiler_params=pltpu.CompilerParams(
            dimension_semantics=("parallel", "parallel"),
            vmem_limit_bytes=vmem_limit,
        ),
    )(alpha_arr, gamma2, beta2, x2)

    if Mp != M:
        out = out[:M]
    return out.reshape(orig_shape)


def _ref(x, alpha, gamma, beta):
    return gamma * jnp.tanh(x * alpha) + beta


if __name__ == "__main__":
    key = jax.random.PRNGKey(0)

    # Case 1: small transformer-like activation (batch, seq, hidden), f32.
    B, S, D = 2, 8, 128
    k1, k2 = jax.random.split(key)
    x = jax.random.normal(k1, (B, S, D), dtype=jnp.float32)
    alpha = jnp.ones((1,), dtype=jnp.float32) * 0.5            # alpha_init=0.5
    gamma = jnp.ones((D,), dtype=jnp.float32)
    beta = jnp.ones((D,), dtype=jnp.float32)

    y = jax.block_until_ready(dynamic_tanh(x, alpha, gamma, beta))
    y_ref = _ref(x, alpha, gamma, beta)
    assert y.shape == x.shape
    assert jnp.allclose(y, y_ref, atol=1e-6, rtol=1e-6), "f32 mismatch vs reference"

    # Case 2: non-divisible leading dims (exercises cdiv grid + row padding).
    B2, S2 = 3, 5
    x2 = jax.random.normal(k2, (B2, S2, D), dtype=jnp.float32)
    y2 = jax.block_until_ready(dynamic_tanh(x2, alpha, gamma, beta))
    y2_ref = _ref(x2, alpha, gamma, beta)
    assert y2.shape == x2.shape
    assert jnp.allclose(y2, y2_ref, atol=1e-6, rtol=1e-6), "padded-tail mismatch"

    # Case 3: bf16 I/O with f32 compute inside the kernel.
    xb = x.astype(jnp.bfloat16)
    yb = jax.block_until_ready(dynamic_tanh(xb, alpha, gamma, beta))
    yb_ref = _ref(xb.astype(jnp.float32), alpha, gamma, beta).astype(jnp.bfloat16)
    assert yb.dtype == jnp.bfloat16 and yb.shape == xb.shape
    assert jnp.allclose(yb.astype(jnp.float32), yb_ref.astype(jnp.float32),
                        atol=2e-2, rtol=2e-2), "bf16 mismatch vs reference"

    print("KERNEL_OK")
</pallas_src>

<mosaic_0001>
module attributes {stable_mosaic.version = 11 : i64} {
  func.func @dyt_kernel(%arg0: i32, %arg1: i32, %arg2: memref<1xf32, #tpu.memory_space<smem>>, %arg3: memref<1x128xf32, #tpu.memory_space<vmem>>, %arg4: memref<1x128xf32, #tpu.memory_space<vmem>>, %arg5: memref<16x128xf32, #tpu.memory_space<vmem>>, %arg6: memref<16x128xf32, #tpu.memory_space<vmem>>) attributes {dimension_semantics = [#tpu.dimension_semantics<parallel>, #tpu.dimension_semantics<parallel>], iteration_bounds = array<i64: 1, 1>, scalar_prefetch = 0 : i64, scratch_operands = 0 : i64, tpu.core_type = #tpu.core_type<tc>, window_params = [{transform_indices = @transform_0, window_bounds = array<i64: 1>}, {transform_indices = @transform_1, window_bounds = array<i64: 1, 128>}, {transform_indices = @transform_2, window_bounds = array<i64: 1, 128>}, {transform_indices = @transform_3, window_bounds = array<i64: 16, 128>}, {transform_indices = @transform_4, window_bounds = array<i64: 16, 128>}]} {
    %c0 = arith.constant 0 : index
    %0 = memref.load %arg2[%c0] : memref<1xf32, #tpu.memory_space<smem>>
    %c0_0 = arith.constant 0 : index
    %c0_1 = arith.constant 0 : index
    %1 = vector.load %arg3[%c0_0, %c0_1] : memref<1x128xf32, #tpu.memory_space<vmem>>, vector<1x128xf32>
    %c0_2 = arith.constant 0 : index
    %c0_3 = arith.constant 0 : index
    %2 = vector.load %arg4[%c0_2, %c0_3] : memref<1x128xf32, #tpu.memory_space<vmem>>, vector<1x128xf32>
    %c0_4 = arith.constant 0 : index
    %c0_5 = arith.constant 0 : index
    %3 = vector.load %arg5[%c0_4, %c0_5] : memref<16x128xf32, #tpu.memory_space<vmem>>, vector<16x128xf32>
    %4 = vector.broadcast %0 : f32 to vector<16x128xf32>
    %5 = arith.mulf %3, %4 : vector<16x128xf32>
    %6 = math.tanh %5 : vector<16x128xf32>
    %7 = vector.broadcast %1 : vector<1x128xf32> to vector<16x128xf32>
    %8 = arith.mulf %7, %6 : vector<16x128xf32>
    %9 = vector.broadcast %2 : vector<1x128xf32> to vector<16x128xf32>
    %10 = arith.addf %8, %9 : vector<16x128xf32>
    %c0_6 = arith.constant 0 : index
    %c0_7 = arith.constant 0 : index
    %11 = vector.load %arg6[%c0_6, %c0_7] : memref<16x128xf32, #tpu.memory_space<vmem>>, vector<16x128xf32>
    tpu.vector_store %arg6[%c0_6, %c0_7], %10 {strides = array<i32>} : memref<16x128xf32, #tpu.memory_space<vmem>>, vector<16x128xf32>,
    return
  }
  func.func @transform_0(%arg0: i32, %arg1: i32) -> i32 {
    %c0_i32 = arith.constant 0 : i32
    %c0_i32_0 = arith.constant 0 : i32
    return %c0_i32 : i32
  }
  func.func @transform_1(%arg0: i32, %arg1: i32) -> (i32, i32) {
    %c0_i32 = arith.constant 0 : i32
    %c0_i32_0 = arith.constant 0 : i32
    return %c0_i32, %arg1 : i32, i32
  }
  func.func @transform_2(%arg0: i32, %arg1: i32) -> (i32, i32) {
    %c0_i32 = arith.constant 0 : i32
    %c0_i32_0 = arith.constant 0 : i32
    return %c0_i32, %arg1 : i32, i32
  }
  func.func @transform_3(%arg0: i32, %arg1: i32) -> (i32, i32) {
    %c0_i32 = arith.constant 0 : i32
    return %arg0, %arg1 : i32, i32
  }
  func.func @transform_4(%arg0: i32, %arg1: i32) -> (i32, i32) {
    %c0_i32 = arith.constant 0 : i32
    return %arg0, %arg1 : i32, i32
  }
}

</mosaic_0001>

<bundles_post_ra>
// kernel: tpu_custom_call.1
= control target key start
LH: loop header
LB: loop body
LE: loop exit
PB: predicated region body
PF: predicated region fallthrough
CT: control target
= control target key end

     0   :  { %10 = vsyncpa [#allocation4], 0  ;;  %s188_s0 = inlined_call_operand.<no memory space> [shape: f32[1], index: 0, kind: input, shape index: {}]   ;;  %s189_s1 = inlined_call_operand.vmem [shape: f32[1,128], index: 1, kind: input, shape index: {}]   ;;  %s190_s2 = inlined_call_operand.vmem [shape: f32[1,128], index: 2, kind: input, shape index: {}]   ;;  %s191_s3 = inlined_call_operand.hbm [shape: f32[16,128], index: 3, kind: input, shape index: {}]   ;;  %s192_s4 = inlined_call_operand.hbm [shape: f32[16,128], index: 4, kind: output, shape index: {}]  }
   0x1   :  { %11 = vsyncpa [#allocation5], 0  ;;  %s22_s17 = sshll.u32 %s191_s3, 4  ;;  %s138_s18 = smov [#allocation3]   ;;  %s23_s17 = int_to_ptr.hbm [resolvable:$true] %s22_s17 }
   0x2   :  { %s24_s19 = sshll.u32 %s138_s18, 4  ;;  %s139_s20 = smov 128   ;;  %s25_s19 = int_to_ptr.vmem [resolvable:$true] %s24_s19 }
   0x3   :  { %s140_s21 = smov 8  }
   0x4   :  { %30 = dma.hbm_to_vmem [thread:$0]  %s23_s17, 256, %s25_s19, [#allocation4], %s139_s20, %s139_s20, %s140_s21  }
   0x5   :  { %134 = dma.done.wait [#allocation4], 256  }
   0x6   :  { %135 = vsyncadd [#allocation4], 4294967040  ;;  %v40_v0 = vstv %s188_s0  ;;  %v38_v1 = vld [vmem:[#allocation3] sm:$0xff]  ;;  %v39_v3 = vld [vmem:[#allocation3 + $0x8] sm:$0xff]  ;;  %s141_s27 = smov [#allocation6]   ;;  %s63_s30 = sshll.u32 %s192_s4, 4  ;;  %s64_s30 = int_to_ptr.hbm [resolvable:$true] %s63_s30 }
   0x7   :  { %v41_v2 = vmul.f32 %v40_v0, %v38_v1  ;;  %v42_v4 = vmul.f32 %v40_v0, %v39_v3  ;;  %v80_v5 = vld [vmem:[%s189_s1] ss:$0 sm:$0xff]  ;;  %s61_s28 = sshll.u32 %s141_s27, 4  ;;  %s62_s28 = int_to_ptr.vmem [resolvable:$true] %s61_s28 }
   0x8   :  { %v81_v6 = vld [vmem:[%s190_s2] ss:$0 sm:$0xff] }
   0x9   :  { %82 = vtanh.f32 %v41_v2 }
   0xa   :  { %84 = vtanh.f32 %v42_v4 }
   0xf   :  { %v83_v7 = vpop.eup %82 }
  0x10   :  { %v85_v8 = vpop.eup %84  ;;  %v48_v9 = vmul.f32 %v83_v7, %v80_v5 }
  0x11   :  { %v49_v10 = vmul.f32 %v85_v8, %v80_v5 }
  0x12   :  { %v53_v11 = vadd.f32 %v81_v6, %v48_v9 }
  0x13   :  { %v54_v12 = vadd.f32 %v81_v6, %v49_v10 }
  0x14   :  { %55 = vst [vmem:[#allocation6] sm:$0xff] %v53_v11 }
  0x15   :  { %56 = vst [vmem:[#allocation6 + $0x8] sm:$0xff] %v54_v12 }
  0x16   :  { %69 = dma.vmem_to_hbm [thread:$0]  %s62_s28, 256, %s64_s30, [#allocation5], %s139_s20, %s139_s20, %s140_s21  }
  0x17   :  { %136 = dma.done.wait [#allocation5], 256  }
  0x18   :  { %137 = vsyncadd [#allocation5], 4294967040 }
  0x19   :  { %74 = vsyncpa [#allocation4], 1 }
  0x1a   :  { %75 = vsyncpa [#allocation5], 1 }

</bundles_post_ra>
